<compile_context>
chip_gen: v6e
topology: v6e:2x2x1
jax: 0.10.0
libtpu: 0.0.40
codegen_flags: <defaults>
</compile_context>

<pallas_src>
import jax
import jax.numpy as jnp
from jax import lax
from jax.experimental import pallas as pl
from jax.experimental.pallas import tpu as pltpu

_BIG = 1e10                          # python float -> inlined literal inside kernels
_EXACT = lax.Precision.HIGHEST       # FPS center gather (feeds KNN selection; tiny matmul)
_FAST = lax.Precision.HIGH           # KNN neighborhood gather (pure output values, 2x fewer MXU passes)

_VMEM_LIMIT = 64 * 1024 * 1024       # explicit scoped-VMEM allowance (safe on v5e/v6e/v7x)
_VMEM_BUDGET = 40 * 1024 * 1024      # target for block+scratch estimate (headroom on v7x 64 MiB)


def _rup(x, m):
    return -(-x // m) * m


def _largest_divisor(x, cap):
    for d in range(min(cap, x), 0, -1):
        if x % d == 0:
            return d
    return 1


def _fps_vmem_bytes(bb, n, cf, g, ckd):
    # lane-padded (last dim -> 128) / sublane-padded (second-last -> 8) estimate, double-buffered
    xk = bb * _rup(ckd, 8) * _rup(n, 128) * 4
    xf = bb * _rup(n, 8) * _rup(cf, 128) * 4
    out = bb * _rup(g, 8) * _rup(cf, 128) * 4
    oneh = g * _rup(bb, 8) * _rup(n, 128) * 4
    return 2 * (xk + xf + out) + oneh


# ---------------------------------------------------------------------------
# Kernel 1: furthest point sampling, batch-stacked (bb batch elements / step).
#   xk_ref  : (bb, Ck, N)  key features, N on lanes
#   xf_ref  : (bb, N, Cf)  full features (gather source)
#   c_ref   : (bb, G, Cf)  output centers
#   oneh_ref: (G, bb, N)   one-hot selections; contiguous (bb, N) store per step (scratch)
# ---------------------------------------------------------------------------
def _fps_kernel(xk_ref, xf_ref, c_ref, oneh_ref):
    bb, ckd, n = xk_ref.shape
    g = oneh_ref.shape[0]

    # Hoist per-channel (bb, N) views once: fully packed (8,128) vregs, so the
    # serialized FPS loop does only VPU adds (no sublane reduce, no 3/8-full vregs).
    xk_ch = tuple(xk_ref[:, k, :] for k in range(ckd))            # ckd x (bb, N)
    lane = lax.broadcasted_iota(jnp.int32, (bb, n), 1)

    # pointnet2 furthest_point_sample: first index is 0, running dist starts at 1e10
    oneh_ref[0] = (lane == 0).astype(jnp.float32)
    sel0 = tuple(xc[:, 0:1] for xc in xk_ch)                      # ckd x (bb, 1)
    dist0 = jnp.full((bb, n), _BIG, jnp.float32)

    def body(i, carry):
        dist, sel = carry
        # exact f32 distance from the last selected point to all N points (VPU, per channel)
        d0 = xk_ch[0] - sel[0]
        d = d0 * d0
        for k in range(1, ckd):
            dk = xk_ch[k] - sel[k]
            d = d + dk * dk
        dist = jnp.minimum(dist, d)
        dmax = jnp.max(dist, axis=1, keepdims=True)               # (bb, 1)
        nxt = jnp.min(jnp.where(dist == dmax, lane, n),           # first-occurrence argmax
                      axis=1, keepdims=True)
        mask = lane == nxt                                        # (bb, N)
        oneh_ref[i] = mask.astype(jnp.float32)                    # contiguous leading-dim store
        new_sel = tuple(jnp.sum(jnp.where(mask, xc, 0.0), axis=1, keepdims=True)
                        for xc in xk_ch)                          # key coords of the new point
        return dist, new_sel

    # TODO(synk): for very large bb*N, hold `dist` in a VMEM scratch ref instead of the carry.
    lax.fori_loop(1, g, body, (dist0, sel0))

    # Epilogue gather: ONE fused relayout (G, bb, N) -> (bb, G, N), then bb contiguous
    # one-hot x features MXU matmuls.  HIGHEST keeps the centers exact (0/1 weights),
    # so the downstream KNN selection cannot be perturbed; this matmul is tiny.
    oneh = pltpu.einshape("gbn->bgn", oneh_ref[...])
    for bi in range(bb):
        c_ref[bi] = jnp.dot(oneh[bi], xf_ref[bi], precision=_EXACT,
                            preferred_element_type=jnp.float32)


def fps_pallas(x_key_t, x_full, num_group):
    """x_key_t: (B, Ck, N), x_full: (B, N, Cf) -> centers (B, G, Cf)."""
    b, ckd, n = x_key_t.shape
    _, _, cf = x_full.shape
    g = num_group

    bb = _largest_divisor(b, 8)                      # batch-stack into vreg sublanes
    if b >= 2 and b // bb < 2:                       # keep >=2 grid steps (2 TCs on v7x)
        bb = _largest_divisor(b, max(1, b // 2))
    while bb > 1 and _fps_vmem_bytes(bb, n, cf, g, ckd) > _VMEM_BUDGET:
        bb = _largest_divisor(b, bb - 1)             # lane-padded Cf blocks: shrink for v7x/v5e

    return pl.pallas_call(
        _fps_kernel,
        out_shape=jax.ShapeDtypeStruct((b, g, cf), jnp.float32),
        grid=(b // bb,),
        in_specs=[
            pl.BlockSpec((bb, ckd, n), lambda i: (i, 0, 0)),
            pl.BlockSpec((bb, n, cf), lambda i: (i, 0, 0)),
        ],
        out_specs=pl.BlockSpec((bb, g, cf), lambda i: (i, 0, 0)),
        scratch_shapes=[pltpu.VMEM((g, bb, n), jnp.float32)],
        compiler_params=pltpu.CompilerParams(
            dimension_semantics=("parallel",),
            vmem_limit_bytes=_VMEM_LIMIT),
    )(x_key_t, x_full)


# ---------------------------------------------------------------------------
# Kernel 2: KNN (k nearest points per center) + fused gather + centering.
# Blocked over centers: each grid step handles gb centers of one batch element.
#   ck_ref : (gb, Ck)    centers, key features
#   cf_ref : (gb, Cf)    centers, full features
#   xk_ref : (Ck, N)     points, key features transposed (N on lanes)
#   xf_ref : (N, Cf)     points, full features
#   nbr_ref: (gb, M, Cf) output neighborhoods (xyz channels re-centered)
#   oneh_ref: (M, gb, N) one-hot selection stack (scratch, contiguous per-neighbor stores)
#   dist_ref: (gb, N)    working distance matrix (scratch)
# ---------------------------------------------------------------------------
def _knn_group_kernel(ck_ref, cf_ref, xk_ref, xf_ref, nbr_ref, oneh_ref, dist_ref):
    gb, ckd = ck_ref.shape
    n = xk_ref.shape[1]
    m = oneh_ref.shape[0]
    cf_dim = nbr_ref.shape[2]

    lane = lax.broadcasted_iota(jnp.int32, (gb, n), 1)

    # exact f32 squared distances on the VPU, built per key channel on 2-D operands
    d0 = ck_ref[:, 0:1] - xk_ref[0:1, :]
    d = d0 * d0                                                    # (gb, N)
    for k in range(1, ckd):
        dk = ck_ref[:, k:k + 1] - xk_ref[k:k + 1, :]
        d = d + dk * dk
    dist_ref[...] = d

    # nearest-first selection; fori_loop + VMEM-resident dist bounds the live set
    # (a fully unrolled Python for keeps dist/lane/temps live across all M iterations).
    def body(j, carry):
        dist = dist_ref[...]
        dmin = jnp.min(dist, axis=1, keepdims=True)                # (gb, 1)
        sel = jnp.min(jnp.where(dist <= dmin, lane, n), axis=1, keepdims=True)
        onehot = lane == sel                                       # (gb, N)
        oneh_ref[j] = onehot.astype(jnp.float32)                   # contiguous leading-dim store
        dist_ref[...] = jnp.where(onehot, _BIG, dist)              # mask out the taken point
        return carry

    lax.fori_loop(0, m, body, jnp.int32(0))

    # ONE fused lane-dense gather on the MXU: (M*gb, N) x (N, Cf).
    # TODO(synk): for very large M*N, chunk per 8 neighbors (overlaps MXU with the
    # selection loop and shrinks the one-hot scratch).
    flat = oneh_ref[...].reshape(m * gb, n)
    pts = jnp.dot(flat, xf_ref[...], precision=_FAST,
                  preferred_element_type=jnp.float32)              # (M*gb, Cf)
    pts = pltpu.einshape("mgc->gmc", pts.reshape(m, gb, cf_dim))   # (gb, M, Cf)

    # re-center only the xyz channels (matches `neighborhood[..., :3] -= center[..., :3]`)
    ch = lax.broadcasted_iota(jnp.int32, (gb, cf_dim), 1)
    delta = jnp.where(ch < 3, cf_ref[...], 0.0)
    nbr_ref[...] = pts - delta[:, None, :]


def knn_group_pallas(centers_key, centers_full, x_key_t, x_full, group_size):
    b, g, ckd = centers_key.shape
    cf = centers_full.shape[-1]
    n = x_key_t.shape[-1]
    m = group_size

    # Block over centers with an (8,128)-friendly tile.  Pad G up to a multiple of 8
    # when needed (padded rows compute garbage and are sliced off) so gb never
    # degenerates to a huge, spilling (G, N) live set.
    if g <= 8:
        gp, gb = g, g
    else:
        gp, gb = _rup(g, 8), 8
        if gp != g:
            pad = ((0, 0), (0, gp - g), (0, 0))
            centers_key = jnp.pad(centers_key, pad)
            centers_full = jnp.pad(centers_full, pad)

    out = pl.pallas_call(
        _knn_group_kernel,
        out_shape=jax.ShapeDtypeStruct((b, gp, m, cf), jnp.float32),
        grid=(b, gp // gb),
        in_specs=[
            pl.BlockSpec((None, gb, ckd), lambda i, j: (i, j, 0)),
            pl.BlockSpec((None, gb, cf), lambda i, j: (i, j, 0)),
            pl.BlockSpec((None, ckd, n), lambda i, j: (i, 0, 0)),
            pl.BlockSpec((None, n, cf), lambda i, j: (i, 0, 0)),
        ],
        out_specs=pl.BlockSpec((None, gb, m, cf), lambda i, j: (i, j, 0, 0)),
        scratch_shapes=[pltpu.VMEM((m, gb, n), jnp.float32),
                        pltpu.VMEM((gb, n), jnp.float32)],
        compiler_params=pltpu.CompilerParams(
            dimension_semantics=("parallel", "parallel"),
            vmem_limit_bytes=_VMEM_LIMIT),
    )(centers_key, centers_full, x_key_t, x_full)
    return out[:, :g] if gp != g else out


# ---------------------------------------------------------------------------
# Group.forward equivalent.
# ---------------------------------------------------------------------------
def group_forward(xyz, num_group, group_size, attribute_index=(0, 1, 2)):
    """xyz: (B, N, C) float32 -> (neighborhood (B, G, M, C), center (B, G, C))."""
    xyz = xyz.astype(jnp.float32)
    idx = jnp.asarray(attribute_index, dtype=jnp.int32)
    x_key = jnp.take(xyz, idx, axis=-1)                  # attribute selection (glue)
    x_key_t = jnp.transpose(x_key, (0, 2, 1))            # (B, Ck, N): N on lanes
    centers = fps_pallas(x_key_t, xyz, num_group)        # (B, G, C)
    centers_key = jnp.take(centers, idx, axis=-1)        # (B, G, Ck)
    neighborhood = knn_group_pallas(centers_key, centers, x_key_t, xyz, group_size)
    return neighborhood, centers


# ---------------------------------------------------------------------------
# Pure-JAX reference (same algorithms) used for validation.
# ---------------------------------------------------------------------------
def group_forward_ref(xyz, num_group, group_size, attribute_index=(0, 1, 2)):
    xyz = xyz.astype(jnp.float32)
    b, n, c = xyz.shape
    idx = jnp.asarray(attribute_index, dtype=jnp.int32)
    xk = jnp.take(xyz, idx, axis=-1)

    def fps_one(pts):
        def body(i, carry):
            dist, last, sel = carry
            d = jnp.sum((pts - pts[last]) ** 2, axis=1)
            dist = jnp.minimum(dist, d)
            nxt = jnp.argmax(dist).astype(jnp.int32)
            return dist, nxt, sel.at[i].set(nxt)
        dist0 = jnp.full((n,), 1e10, jnp.float32)
        sel0 = jnp.zeros((num_group,), jnp.int32)
        _, _, sel = lax.fori_loop(1, num_group, body, (dist0, jnp.int32(0), sel0))
        return sel

    fps_idx = jax.vmap(fps_one)(xk)                               # (B, G)
    centers = jnp.take_along_axis(xyz, fps_idx[..., None], axis=1)  # (B, G, C)
    ck = jnp.take(centers, idx, axis=-1)

    d = jnp.sum((ck[:, :, None, :] - xk[:, None, :, :]) ** 2, axis=-1)   # (B, G, N)
    _, knn_idx = lax.top_k(-d, group_size)                        # nearest-first
    pts = jnp.take_along_axis(
        jnp.broadcast_to(xyz[:, None], (b, num_group, n, c)), knn_idx[..., None], axis=2)
    delta = jnp.concatenate([centers[..., :3], jnp.zeros_like(centers[..., 3:])], axis=-1)
    neighborhood = pts - delta[:, :, None, :]
    return neighborhood, centers


if __name__ == "__main__":
    B, N, G, M = 2, 128, 16, 8
    k1, k2 = jax.random.split(jax.random.PRNGKey(0))

    # Case 1: plain point cloud, feature_dim == 3 (attribute=['xyz'])
    xyz = jax.random.normal(k1, (B, N, 3), dtype=jnp.float32)
    nbr, ctr = group_forward(xyz, G, M, (0, 1, 2))
    jax.block_until_ready((nbr, ctr))
    nbr_r, ctr_r = group_forward_ref(xyz, G, M, (0, 1, 2))
    assert nbr.shape == (B, G, M, 3) and ctr.shape == (B, G, 3)
    assert jnp.allclose(ctr, ctr_r, atol=1e-4, rtol=1e-4)
    assert jnp.allclose(nbr, nbr_r, atol=1e-4, rtol=1e-4)

    # Case 2: Gaussian-splat style features (B, N, 14), grouping keyed on xyz channels
    feats = jax.random.normal(k2, (B, N, 14), dtype=jnp.float32)
    nbr2, ctr2 = group_forward(feats, G, M, (0, 1, 2))
    jax.block_until_ready((nbr2, ctr2))
    nbr2_r, ctr2_r = group_forward_ref(feats, G, M, (0, 1, 2))
    assert nbr2.shape == (B, G, M, 14) and ctr2.shape == (B, G, 14)
    assert jnp.allclose(ctr2, ctr2_r, atol=1e-4, rtol=1e-4)
    assert jnp.allclose(nbr2, nbr2_r, atol=1e-4, rtol=1e-4)

    print("KERNEL_OK")
</pallas_src>

<mosaic_0001>
module attributes {stable_mosaic.version = 11 : i64} {
  func.func @_fps_kernel(%arg0: i32, %arg1: memref<1x3x128xf32, #tpu.memory_space<vmem>>, %arg2: memref<1x128x3xf32, #tpu.memory_space<vmem>>, %arg3: memref<1x16x3xf32, #tpu.memory_space<vmem>>, %arg4: memref<16x1x128xf32, #tpu.memory_space<vmem>>) attributes {dimension_semantics = [#tpu.dimension_semantics<parallel>], iteration_bounds = array<i64: 2>, scalar_prefetch = 0 : i64, scratch_operands = 1 : i64, tpu.core_type = #tpu.core_type<tc>, window_params = [{transform_indices = @transform_0, window_bounds = array<i64: 1, 3, 128>}, {transform_indices = @transform_1, window_bounds = array<i64: 1, 128, 3>}, {transform_indices = @transform_2, window_bounds = array<i64: 1, 16, 3>}]} {
    %c0 = arith.constant 0 : index
    %c0_0 = arith.constant 0 : index
    %c0_1 = arith.constant 0 : index
    %0 = vector.load %arg1[%c0, %c0_0, %c0_1] : memref<1x3x128xf32, #tpu.memory_space<vmem>>, vector<1x1x128xf32>
    %1 = vector.shape_cast %0 : vector<1x1x128xf32> to vector<1x128xf32>
    %c0_2 = arith.constant 0 : index
    %c1 = arith.constant 1 : index
    %c0_3 = arith.constant 0 : index
    %2 = vector.load %arg1[%c0_2, %c1, %c0_3] : memref<1x3x128xf32, #tpu.memory_space<vmem>>, vector<1x1x128xf32>
    %3 = vector.shape_cast %2 : vector<1x1x128xf32> to vector<1x128xf32>
    %c0_4 = arith.constant 0 : index
    %c2 = arith.constant 2 : index
    %c0_5 = arith.constant 0 : index
    %4 = vector.load %arg1[%c0_4, %c2, %c0_5] : memref<1x3x128xf32, #tpu.memory_space<vmem>>, vector<1x1x128xf32>
    %5 = vector.shape_cast %4 : vector<1x1x128xf32> to vector<1x128xf32>
    %6 = tpu.iota {dimensions = array<i32: 1>} : vector<1x128xi32>
    %c0_i32 = arith.constant 0 : i32
    %7 = vector.broadcast %c0_i32 : i32 to vector<1x128xi32>
    %8 = arith.cmpi eq, %6, %7 : vector<1x128xi32>
    %9 = arith.extui %8 : vector<1x128xi1> to vector<1x128xi32>
    %10 = arith.sitofp %9 : vector<1x128xi32> to vector<1x128xf32>
    %c0_6 = arith.constant 0 : index
    %c0_7 = arith.constant 0 : index
    %c0_8 = arith.constant 0 : index
    %11 = vector.load %arg4[%c0_6, %c0_7, %c0_8] : memref<16x1x128xf32, #tpu.memory_space<vmem>>, vector<1x1x128xf32>
    %12 = vector.shape_cast %11 : vector<1x1x128xf32> to vector<1x128xf32>
    %13 = vector.shape_cast %10 : vector<1x128xf32> to vector<1x1x128xf32>
    tpu.vector_store %arg4[%c0_6, %c0_7, %c0_8], %13 {strides = array<i32>} : memref<16x1x128xf32, #tpu.memory_space<vmem>>, vector<1x1x128xf32>,
    %14 = vector.extract_strided_slice %1 {offsets = [0, 0], sizes = [1, 1], strides = [1, 1]} : vector<1x128xf32> to vector<1x1xf32>
    %15 = vector.extract_strided_slice %3 {offsets = [0, 0], sizes = [1, 1], strides = [1, 1]} : vector<1x128xf32> to vector<1x1xf32>
    %16 = vector.extract_strided_slice %5 {offsets = [0, 0], sizes = [1, 1], strides = [1, 1]} : vector<1x128xf32> to vector<1x1xf32>
    %cst = arith.constant 1.000000e+10 : f32
    %17 = vector.broadcast %cst : f32 to vector<1x128xf32>
    %c1_i32 = arith.constant 1 : i32
    %c15_i32 = arith.constant 15 : i32
    %18 = arith.addi %c1_i32, %c15_i32 : i32
    %c1_i32_9 = arith.constant 1 : i32
    %19:4 = scf.for %arg5 = %c1_i32 to %18 step %c1_i32_9 iter_args(%arg6 = %17, %arg7 = %14, %arg8 = %15, %arg9 = %16) -> (vector<1x128xf32>, vector<1x1xf32>, vector<1x1xf32>, vector<1x1xf32>)  : i32 {
      %29 = vector.broadcast %arg7 : vector<1x1xf32> to vector<1x128xf32>
      %30 = arith.subf %1, %29 : vector<1x128xf32>
      %31 = arith.mulf %30, %30 : vector<1x128xf32>
      %32 = vector.broadcast %arg8 : vector<1x1xf32> to vector<1x128xf32>
      %33 = arith.subf %3, %32 : vector<1x128xf32>
      %34 = arith.mulf %33, %33 : vector<1x128xf32>
      %35 = arith.addf %31, %34 : vector<1x128xf32>
      %36 = vector.broadcast %arg9 : vector<1x1xf32> to vector<1x128xf32>
      %37 = arith.subf %5, %36 : vector<1x128xf32>
      %38 = arith.mulf %37, %37 : vector<1x128xf32>
      %39 = arith.addf %35, %38 : vector<1x128xf32>
      %40 = arith.minimumf %arg6, %39 : vector<1x128xf32>
      %cst_21 = arith.constant dense<0xFF800000> : vector<1xf32>
      %41 = vector.multi_reduction <maximumf>, %40, %cst_21 [1] : vector<1x128xf32> to vector<1xf32>
      %42 = vector.shape_cast %41 : vector<1xf32> to vector<1x1xf32>
      %43 = vector.broadcast %42 : vector<1x1xf32> to vector<1x128xf32>
      %44 = arith.cmpf oeq, %40, %43 : vector<1x128xf32>
      %c128_i32 = arith.constant 128 : i32
      %45 = vector.broadcast %c128_i32 : i32 to vector<1x128xi32>
      %46 = arith.select %44, %6, %45 : vector<1x128xi1>, vector<1x128xi32>
      %cst_22 = arith.constant dense<2147483647> : vector<1xi32>
      %47 = vector.multi_reduction <minsi>, %46, %cst_22 [1] : vector<1x128xi32> to vector<1xi32>
      %48 = vector.shape_cast %47 : vector<1xi32> to vector<1x1xi32>
      %49 = vector.broadcast %48 : vector<1x1xi32> to vector<1x128xi32>
      %50 = arith.cmpi eq, %6, %49 : vector<1x128xi32>
      %51 = arith.extui %50 : vector<1x128xi1> to vector<1x128xi32>
      %52 = arith.sitofp %51 : vector<1x128xi32> to vector<1x128xf32>
      %53 = arith.index_cast %arg5 : i32 to index
      %c0_23 = arith.constant 0 : index
      %c0_24 = arith.constant 0 : index
      %54 = vector.load %arg4[%53, %c0_23, %c0_24] : memref<16x1x128xf32, #tpu.memory_space<vmem>>, vector<1x1x128xf32>
      %55 = vector.shape_cast %54 : vector<1x1x128xf32> to vector<1x128xf32>
      %56 = vector.shape_cast %52 : vector<1x128xf32> to vector<1x1x128xf32>
      tpu.vector_store %arg4[%53, %c0_23, %c0_24], %56 {strides = array<i32>} : memref<16x1x128xf32, #tpu.memory_space<vmem>>, vector<1x1x128xf32>,
      %cst_25 = arith.constant 0.000000e+00 : f32
      %57 = vector.broadcast %cst_25 : f32 to vector<1x128xf32>
      %58 = arith.select %50, %1, %57 : vector<1x128xi1>, vector<1x128xf32>
      %cst_26 = arith.constant dense<0.000000e+00> : vector<1xf32>
      %59 = vector.multi_reduction <add>, %58, %cst_26 [1] : vector<1x128xf32> to vector<1xf32>
      %60 = vector.shape_cast %59 : vector<1xf32> to vector<1x1xf32>
      %cst_27 = arith.constant 0.000000e+00 : f32
      %61 = vector.broadcast %cst_27 : f32 to vector<1x128xf32>
      %62 = arith.select %50, %3, %61 : vector<1x128xi1>, vector<1x128xf32>
      %cst_28 = arith.constant dense<0.000000e+00> : vector<1xf32>
      %63 = vector.multi_reduction <add>, %62, %cst_28 [1] : vector<1x128xf32> to vector<1xf32>
      %64 = vector.shape_cast %63 : vector<1xf32> to vector<1x1xf32>
      %cst_29 = arith.constant 0.000000e+00 : f32
      %65 = vector.broadcast %cst_29 : f32 to vector<1x128xf32>
      %66 = arith.select %50, %5, %65 : vector<1x128xi1>, vector<1x128xf32>
      %cst_30 = arith.constant dense<0.000000e+00> : vector<1xf32>
      %67 = vector.multi_reduction <add>, %66, %cst_30 [1] : vector<1x128xf32> to vector<1xf32>
      %68 = vector.shape_cast %67 : vector<1xf32> to vector<1x1xf32>
      scf.yield %40, %60, %64, %68 : vector<1x128xf32>, vector<1x1xf32>, vector<1x1xf32>, vector<1x1xf32>
    }
    %c15_i32_10 = arith.constant 15 : i32
    %c0_11 = arith.constant 0 : index
    %c0_12 = arith.constant 0 : index
    %c0_13 = arith.constant 0 : index
    %20 = vector.load %arg4[%c0_11, %c0_12, %c0_13] : memref<16x1x128xf32, #tpu.memory_space<vmem>>, vector<16x1x128xf32>
    %21 = tpu.transpose %20, [1, 0, 2] : vector<16x1x128xf32> -> vector<1x16x128xf32>
    %22 = vector.shape_cast %21 : vector<1x16x128xf32> to vector<16x128xf32>
    %c0_14 = arith.constant 0 : index
    %c0_15 = arith.constant 0 : index
    %c0_16 = arith.constant 0 : index
    %23 = vector.load %arg2[%c0_14, %c0_15, %c0_16] : memref<1x128x3xf32, #tpu.memory_space<vmem>>, vector<1x128x3xf32>
    %24 = vector.shape_cast %23 : vector<1x128x3xf32> to vector<128x3xf32>
    %cst_17 = arith.constant dense<0.000000e+00> : vector<16x3xf32>
    %25 = tpu.matmul %22, %24, %cst_17 {dimension_numbers = #tpu.dot_dimension_numbers<[1], [0], [0], [1], [0, 0, 1, 1], [], []>, precision = #tpu.contract_precision<fp32>} : vector<16x128xf32>, vector<128x3xf32>, vector<16x3xf32> -> vector<16x3xf32>
    %c0_18 = arith.constant 0 : index
    %c0_19 = arith.constant 0 : index
    %c0_20 = arith.constant 0 : index
    %26 = vector.load %arg3[%c0_18, %c0_19, %c0_20] : memref<1x16x3xf32, #tpu.memory_space<vmem>>, vector<1x16x3xf32>
    %27 = vector.shape_cast %26 : vector<1x16x3xf32> to vector<16x3xf32>
    %28 = vector.shape_cast %25 : vector<16x3xf32> to vector<1x16x3xf32>
    tpu.vector_store %arg3[%c0_18, %c0_19, %c0_20], %28 {strides = array<i32>} : memref<1x16x3xf32, #tpu.memory_space<vmem>>, vector<1x16x3xf32>,
    return
  }
  func.func @transform_0(%arg0: i32) -> (i32, i32, i32) {
    %c0_i32 = arith.constant 0 : i32
    %c0_i32_0 = arith.constant 0 : i32
    %c0_i32_1 = arith.constant 0 : i32
    return %arg0, %c0_i32, %c0_i32_0 : i32, i32, i32
  }
  func.func @transform_1(%arg0: i32) -> (i32, i32, i32) {
    %c0_i32 = arith.constant 0 : i32
    %c0_i32_0 = arith.constant 0 : i32
    %c0_i32_1 = arith.constant 0 : i32
    return %arg0, %c0_i32, %c0_i32_0 : i32, i32, i32
  }
  func.func @transform_2(%arg0: i32) -> (i32, i32, i32) {
    %c0_i32 = arith.constant 0 : i32
    %c0_i32_0 = arith.constant 0 : i32
    %c0_i32_1 = arith.constant 0 : i32
    return %arg0, %c0_i32, %c0_i32_0 : i32, i32, i32
  }
}

</mosaic_0001>

<bundles_post_ra>
// kernel: tpu_custom_call.1
= control target key start
LH: loop header
LB: loop body
LE: loop exit
PB: predicated region body
PF: predicated region fallthrough
CT: control target
= control target key end

     0   :  { %s1617_s9 = smov 0   ;;  %s2108_s0 = inlined_call_operand.vmem [shape: f32[2,3,128], index: 0, kind: input, shape index: {}]   ;;  %s2109_s1 = inlined_call_operand.vmem [shape: f32[2,128,3], index: 1, kind: input, shape index: {}]   ;;  %s2110_s2 = inlined_call_operand.vmem [shape: f32[2,16,3], index: 2, kind: output, shape index: {}]  }
   0x1 LB: > { %s1162_s10 = sadd.s32 4294967295, %s1576_s9   ;;  %p1166_p0 = scmp.ge.s32.totalorder %s1576_s9, 1  ;;  %s1576_s9 = sphi %s1617_s9, %s12_s9  }
   0x2   : > { %p121_p1 = scmp.lt.s32.totalorder %s1576_s9, 3 }
   0x4   : > { %p122_p2 = pnand %p1166_p0, %p121_p1 }
   0x6   : > { %125 = sbr.rel (%p122_p2) target bundleno = 1028 (0x404), region = 28 }
   0xb   : > { %p147_p3 = scmp.lt.s32.totalorder %s1162_s10, 1  ;;  %v164_v0 = vlaneseq  ;;  %v1598_v2 = vmov 0.0   ;;  %v1657_v10 = vmov 1e+10   ;;  %s1659_s23 = smov 1  }
   0xd   : > { %s2151_s10 = smov (!%p147_p3, %s1162_s10), 1  ;;  %v1626_v1 = vand.u32 127, %v164_v0 }
   0xe   : > { %s1167_s11 = sshll.u32 %s2151_s10, 2  ;;  %s1176_s12 = sshll.u32 %s2151_s10, 7 }
   0xf   : > { %vm166_vm0 = vcmp.eq.s32.totalorder %v1626_v1, 0  ;;  %s150_s15 = scalar_lea.vmem %s2108_s0, %s1167_s11  ;;  %s1635_s18 = scalar_lea.vmem %s2109_s1, %s1176_s12 }
  0x10   : > { %v1172_v3 = vsel %vm166_vm0, 1.0, %v1598_v2  ;;  %s1177_s19 = sshll.u32 %s2151_s10, 4  ;;  %v1637_v4 = vld [vmem:[%s150_s15] sm:$0x1]   ;;  %v1639_v5 = vld [vmem:[%s150_s15 + $0x1] sm:$0x1]  }
  0x11   : > { %169 = vst [vmem:[#allocation2] sm:$0x1] %v1172_v3  ;;  %s1644_s22 = scalar_lea.vmem %s2110_s2, %s1177_s19  ;;  %v1646_v6 = vld [vmem:[%s150_s15 + $0x2] sm:$0x1]   ;;  %v2130_v8 = vmov %v1639_v5  ;;  %v2131_v9 = vmov %v1637_v4 }
  0x12   : > { %v2129_v7 = vmov %v1646_v6 }
  0x13 LB: >> { %v1599_v11 = vmov 0   ;;  %vm204_vm1 = vcmask 1040384   ;;  %v1600_v38 = vmov 0.0   ;;  %s228_s24 = scalar_lea.vmem [#allocation2], %s1596_s23  ;;  %s175_s23 = sadd.s32 1, %s1596_s23   ;;  %s1596_s23 = sphi %s1659_s23, %s175_s23   ;;  %v1592_v10 = vphi %v1657_v10, %v203_v10   ;;  %v1588_v9 = vphi %v2131_v9, %v233_v9   ;;  %v1584_v8 = vphi %v2130_v8, %v237_v8   ;;  %v1580_v7 = vphi %v2129_v7, %v241_v7  }
  0x14   : >> { %1548 = vset.pattern.permute.xlu0 %v1599_v11  ;;  %1549 = vset.pattern.permute.xlu1 %v1599_v11  ;;  %p172_p4 = scmp.ge.s32.totalorder %s175_s23, 16  }
  0x15   : >> { %182 = vperm.xlu0 %1548, %v1588_v9   ;;  %197 = vperm.xlu1 %1549, %v1580_v7   ;;  %v273_v46 = vld [vmem:[%s1635_s18 + $0x78] sm:$0xff] (%p172_p4)  ;;  %v272_v47 = vld [vmem:[%s1635_s18 + $0x70] sm:$0xff] (%p172_p4)  ;;  %v271_v48 = vld [vmem:[%s1635_s18 + $0x68] sm:$0xff] (%p172_p4)  ;;  %vm1074_vm5 = vcmask (%p172_p4), 23552  }
  0x16   : > { %v1696_v49 = vand.u32 (%p172_p4), 4294901760, %v273_v46  ;;  %v1698_v50 = vand.u32 (%p172_p4), 4294901760, %v272_v47  ;;  %v1700_v51 = vand.u32 (%p172_p4), 4294901760, %v271_v48  ;;  %v270_v52 = vld [vmem:[%s1635_s18 + $0x60] sm:$0xff] (%p172_p4)  ;;  %v269_v53 = vld [vmem:[%s1635_s18 + $0x58] sm:$0xff] (%p172_p4)  ;;  %v268_v54 = vld [vmem:[%s1635_s18 + $0x50] sm:$0xff] (%p172_p4) }
  0x17   : > { %v1705_v55 = vand.u32 (%p172_p4), 4294901760, %v270_v52  ;;  %v1707_v56 = vand.u32 (%p172_p4), 4294901760, %v269_v53  ;;  %v1709_v57 = vand.u32 (%p172_p4), 4294901760, %v268_v54  ;;  %v267_v58 = vld [vmem:[%s1635_s18 + $0x48] sm:$0xff] (%p172_p4)  ;;  %v266_v59 = vld [vmem:[%s1635_s18 + $0x40] sm:$0xff] (%p172_p4) }
  0x18   : > { %1286 = vmatprep.subr.mxu0 (%p172_p4), %v1696_v49  ;;  %v1715_v60 = vsub.f32 (%p172_p4), %v273_v46, %v1696_v49  ;;  %v1718_v61 = vsub.f32 (%p172_p4), %v272_v47, %v1698_v50  ;;  %v1720_v62 = vand.u32 (%p172_p4), 4294901760, %v267_v58  ;;  %v1723_v63 = vsub.f32 (%p172_p4), %v271_v48, %v1700_v51 }
  0x19   : >> { %189 = vperm.xlu0 %1548, %v1584_v8   ;;  %1287 = vmatpush3.msra.mxu0 (%p172_p4), %v1696_v49  ;;  %v1728_v2 = vsub.f32 (%p172_p4), %v270_v52, %v1705_v55  ;;  %v1731_v3 = vsub.f32 (%p172_p4), %v269_v53, %v1707_v56  ;;  %v1601_v52 = vmov (%p172_p4), 1966171168  }
  0x1a   : > { %1288 = vmatprep.subr.mxu0 (%p172_p4), %v1698_v50  ;;  %v295_v53 = vunpack.c.l.s4 (%p172_p4), %v1601_v52  ;;  %v1865_v52 = vld [vmem:[%s1635_s18] sm:$0xff] (%p172_p4) }
  0x1b   : > { %1289 = vmatpush3.msra.mxu0 (%p172_p4), %v1698_v50  ;;  %v1753_v11 = vand.u32 (%p172_p4), 4294901760, %v1731_v3 }
  0x1c   : > { %1290 = vmatprep.subr.mxu0 (%p172_p4), %v1700_v51 }
  0x1d   : > { %2135 = vst [vmem:[#allocation6_spill] sm:$0xff] (%p172_p4), %v1753_v11  ;;  %1291 = vmatpush3.msra.mxu0 (%p172_p4), %v1700_v51 }
  0x1e   : > { %1292 = vmatprep.subr.mxu0 (%p172_p4), %v1705_v55 }
  0x1f   : > { %1293 = vmatpush3.msra.mxu0 (%p172_p4), %v1705_v55 }
  0x20   : > { %1294 = vmatprep.subr.mxu0 (%p172_p4), %v1707_v56 }
  0x21   : > { %1295 = vmatpush3.msra.mxu0 (%p172_p4), %v1707_v56 }
  0x22   : > { %1296 = vmatprep.subr.mxu0 (%p172_p4), %v1709_v57 }
  0x23   : > { %1297 = vmatpush3.msra.mxu0 (%p172_p4), %v1709_v57 }
  0x24   : > { %1298 = vmatprep.subr.mxu0 (%p172_p4), %v1720_v62 }
  0x25   : > { %1299 = vmatpush3.msra.mxu0 (%p172_p4), %v1720_v62 }
  0x90   : >> { %v183_v12 = vpop.permute.xlu0 %182  ;;  %v198_v13 = vpop.permute.xlu1 %197 }
  0x91   : >> { %v185_v14 = vsub.f32 %v1637_v4, %v183_v12  ;;  %v200_v15 = vsub.f32 %v1646_v6, %v198_v13  ;;  %v1756_v12 = vsub.f32 (%p172_p4), %v268_v54, %v1709_v57  ;;  %v263_v13 = vld [vmem:[%s1635_s18 + $0x28] sm:$0xff] (%p172_p4) }
  0x93   : >> { %v186_v18 = vmul.f32 %v185_v14, %v185_v14  ;;  %v201_v20 = vmul.f32 %v200_v15, %v200_v15 }
  0x94   : >> { %v190_v16 = vpop.permute.xlu0 %189 }
  0x95   : >> { %v192_v17 = vsub.f32 %v1639_v5, %v190_v16 }
  0x97   : >> { %v193_v19 = vmul.f32 %v192_v17, %v192_v17  ;;  %v1767_v17 = vsub.f32 (%p172_p4), %v267_v58, %v1720_v62 }
  0x99   : >> { %v194_v21 = vadd.f32 %v193_v19, %v186_v18 }
  0x9b   : >> { %v202_v22 = vadd.f32 %v201_v20, %v194_v21  ;;  %v1775_v20 = vand.u32 (%p172_p4), 4294901760, %v1756_v12  ;;  %v262_v21 = vld [vmem:[%s1635_s18 + $0x20] sm:$0xff] (%p172_p4) }
  0x9d   : >> { %v203_v10 = vmin.f32 %v1592_v10, %v202_v22   ;;  %2136 = vst [vmem:[#allocation7_spill] sm:$0xff] (%p172_p4), %v1775_v20 }
  0x9f   : >> { %v205_v23 = vsel %vm204_vm1, %v203_v10, -inf }
  0xa0   : >> { %206 = vmax.xlane.f32.xlu1 %v205_v23 }
 0x129   : >> { %v207_v24 = vpop.xlane.xlu1 %206 }
 0x12a   : >> { %vm208_vm2 = vcmp.eq.f32.partialorder %v203_v10, %v207_v24  ;;  %v523_v24 = vsub.f32 (%p172_p4), %v1731_v3, %v1753_v11 }
 0x12b   : >> { %v209_v25 = vsel %vm208_vm2, %v1626_v1, 128 }
 0x12c   : >> { %v210_v26 = vsel %vm204_vm1, %v209_v25, 2147483647  ;;  %v1781_v25 = vand.u32 (%p172_p4), 4294901760, %v263_v13 }
 0x12d   : >> { %v212_v27 = vshra.s32 %v210_v26, 16  ;;  %v211_v29 = vand.u32 65535, %v210_v26  ;;  %v1785_v26 = vand.u32 (%p172_p4), 4294901760, %v1767_v17 }
 0x12e   : > { %v1834_v46 = vsub.f32 (%p172_p4), %v263_v13, %v1781_v25 }
 0x12f   : >> { %v214_v28 = vcvt.s32.f32 %v212_v27  ;;  %v213_v31 = vcvt.s32.f32 %v211_v29  ;;  %2137 = vst [vmem:[#allocation8_spill] sm:$0xff] (%p172_p4), %v1785_v26  ;;  %v1794_v29 = vld [vmem:[%s1635_s18 + $0x10] sm:$0xff] (%p172_p4)  ;;  %v537_v58 = vsub.f32 (%p172_p4), %v1767_v17, %v1785_v26 }
 0x131   : >> { %215 = vmin.xlane.f32.xlu0 %v214_v28 }
 0x1ba   : >> { %v216_v30 = vpop.xlane.xlu0 %215 }
 0x1bb   : >> { %vm217_vm3 = vcmp.eq.f32.partialorder %v214_v28, %v216_v30  ;;  %v222_v33 = vcvt.f32.s32 %v216_v30  ;;  %v1791_v28 = vld [vmem:[%s1635_s18 + $0x18] sm:$0xff] (%p172_p4)  ;;  %v1797_v30 = vld [vmem:[%s1635_s18 + $0x8] sm:$0xff] (%p172_p4) }
 0x1bc   : >> { %v218_v32 = vsel %vm217_vm3, %v213_v31, inf  ;;  %v1800_v31 = vshrl.u32 (%p172_p4), %v164_v0, 7 }
 0x1bd   : >> { %219 = vmin.xlane.f32.xlu0 %v218_v32  ;;  %v223_v35 = vshll.u32 %v222_v33, 16  ;;  %v530_v33 = vsub.f32 (%p172_p4), %v1756_v12, %v1775_v20 }
 0x246   : >> { %v220_v34 = vpop.xlane.xlu0 %219 }
 0x247   : >> { %v221_v36 = vcvt.f32.s32 %v220_v34  ;;  %v1805_v34 = vand.u32 (%p172_p4), 4294901760, %v262_v21 }
 0x249   : >> { %v224_v37 = vadd.s32 %v223_v35, %v221_v36 }
 0x24b   : >> { %vm225_vm4 = vcmp.eq.s32.totalorder %v1626_v1, %v224_v37  ;;  %v265_v1 = vld [vmem:[%s1635_s18 + $0x38] sm:$0xff] (%p172_p4) }
 0x24c   : >> { %v1173_v39 = vsel %vm225_vm4, 1.0, %v1600_v38  ;;  %v234_v40 = vsel %vm225_vm4, %v1639_v5, 0.0  ;;  %v230_v41 = vsel %vm225_vm4, %v1637_v4, 0.0  ;;  %v238_v44 = vsel %vm225_vm4, %v1646_v6, 0.0 }
 0x24d   : >> { %229 = vst [vmem:[%s228_s24] sm:$0x1] %v1173_v39  ;;  %v235_v42 = vsel %vm204_vm1, %v234_v40, 0.0  ;;  %v231_v43 = vsel %vm204_vm1, %v230_v41, 0.0  ;;  %v239_v45 = vsel %vm204_vm1, %v238_v44, 0.0  ;;  %v1735_v4 = vand.u32 (%p172_p4), 4294901760, %v1715_v60 }
 0x24e   : >> { %236 = vadd.xlane.f32.xlu0 %v235_v42  ;;  %232 = vadd.xlane.f32.xlu1 %v231_v43  ;;  %v1738_v5 = vand.u32 (%p172_p4), 4294901760, %v1718_v61  ;;  %v1741_v6 = vand.u32 (%p172_p4), 4294901760, %v1723_v63  ;;  %v1750_v10 = vand.u32 (%p172_p4), 4294901760, %v265_v1  ;;  %v524_v44 = vand.u32 (%p172_p4), 4294901760, %v523_v24 }
 0x24f   : > { %v495_v14 = vsub.f32 (%p172_p4), %v1715_v60, %v1735_v4  ;;  %v1862_v24 = vand.u32 (%p172_p4), 4294901760, %v1834_v46 }
 0x250   : > { %2132 = vst [vmem:[#allocation3_spill] sm:$0xff] (%p172_p4), %v1738_v5  ;;  %2133 = vst [vmem:[#allocation4_spill] sm:$0xff] (%p172_p4), %v1741_v6  ;;  %v502_v15 = vsub.f32 (%p172_p4), %v1718_v61, %v1738_v5  ;;  %v509_v16 = vsub.f32 (%p172_p4), %v1723_v63, %v1741_v6  ;;  %v1808_v35 = vsub.f32 (%p172_p4), %v265_v1, %v1750_v10  ;;  %v1847_v1 = vand.u32 (%p172_p4), 4294901760, %v1794_v29 }
 0x251   : > { %v496_v22 = vand.u32 (%p172_p4), 4294901760, %v495_v14  ;;  %v531_v14 = vand.u32 (%p172_p4), 4294901760, %v530_v33  ;;  %v1868_v33 = vsub.f32 (%p172_p4), %v262_v21, %v1805_v34 }
 0x252   : >> { %240 = vadd.xlane.f32.xlu1 %v239_v45  ;;  %v503_v23 = vand.u32 (%p172_p4), 4294901760, %v502_v15  ;;  %v510_v32 = vand.u32 (%p172_p4), 4294901760, %v509_v16  ;;  %v1831_v45 = vand.u32 (%p172_p4), 4294901760, %v1808_v35  ;;  %v1856_v16 = vand.u32 (%p172_p4), 4294901760, %v1797_v30 }
 0x253   : > { %1321 = vmatprep.subr.mxu1 (%p172_p4), %v496_v22 }
 0x254   : > { %v1810_v36 = vld [vmem:[#allocation2] sm:$0x1] (%p172_p4)  ;;  %v1812_v37 = vld [vmem:[#allocation2 + $0x1] sm:$0x1] (%p172_p4)  ;;  %1322 = vmatpush3.msra.mxu1 (%p172_p4), %v496_v22  ;;  %v1821_v40 = vld [vmem:[#allocation2 + $0x2] sm:$0x1] (%p172_p4) }
 0x255   : > { %v1823_v41 = vld [vmem:[#allocation2 + $0x3] sm:$0x1] (%p172_p4)  ;;  %v1825_v42 = vld [vmem:[#allocation2 + $0x4] sm:$0x1] (%p172_p4)  ;;  %v1827_v43 = vld [vmem:[#allocation2 + $0x5] sm:$0x1] (%p172_p4)  ;;  %1323 = vmatprep.subr.mxu1 (%p172_p4), %v503_v23 }
 0x256   : > { %2139 = vst [vmem:[#allocation10_spill] sm:$0xff] (%p172_p4), %v1831_v45  ;;  %v1836_v47 = vld [vmem:[#allocation2 + $0x6] sm:$0x1] (%p172_p4)  ;;  %v1838_v48 = vld [vmem:[#allocation2 + $0x7] sm:$0x1] (%p172_p4)  ;;  %1324 = vmatpush3.msra.mxu1 (%p172_p4), %v503_v23  ;;  %v551_v23 = vsub.f32 (%p172_p4), %v1808_v35, %v1831_v45  ;;  %v291_v45 = vcombine.low (%p172_p4), %v1821_v40, %v1823_v41  ;;  %v292_v11 = vcombine.low (%p172_p4), %v1825_v42, %v1827_v43  ;;  %v1888_v40 = vand.u32 (%p172_p4), 4294901760, %v1865_v52 }
 0x257   : > { %v250_v54 = vld [vmem:[#allocation2 + $0x8] sm:$0x1] (%p172_p4)  ;;  %v251_v13 = vld [vmem:[#allocation2 + $0x9] sm:$0x1] (%p172_p4)  ;;  %1325 = vmatprep.subr.mxu1 (%p172_p4), %v510_v32  ;;  %v253_v22 = vld [vmem:[#allocation2 + $0xb] sm:$0x1] (%p172_p4) }
 0x258   : > { %1326 = vmatpush3.msra.mxu1 (%p172_p4), %v510_v32  ;;  %v254_v26 = vld [vmem:[#allocation2 + $0xc] sm:$0x1] (%p172_p4)  ;;  %v255_v20 = vld [vmem:[#allocation2 + $0xd] sm:$0x1] (%p172_p4)  ;;  %v256_v21 = vld [vmem:[#allocation2 + $0xe] sm:$0x1] (%p172_p4) }
 0x259   : > { %v257_v6 = vld [vmem:[#allocation2 + $0xf] sm:$0x1] (%p172_p4)  ;;  %v341_v43 = vcombine.low (%p172_p4), %v254_v26, %v255_v20 }
 0x2d7   : >> { %v237_v8 = vpop.xlane.xlu0 %236   ;;  %v233_v9 = vpop.xlane.xlu1 %232   ;;  %174 = sbr.rel (!%p172_p4) target bundleno = 19 (0x13), region = 69 }
 0x2d8   : > { %v264_v8 = vld [vmem:[%s1635_s18 + $0x30] sm:$0xff] (%p172_p4)  ;;  %v1748_v9 = vand.u32 (%p172_p4), 4294901760, %v1728_v2 }
 0x2d9   : > { %v1772_v19 = vand.u32 (%p172_p4), 4294901760, %v264_v8 }
 0x2da   : > { %2134 = vst [vmem:[#allocation5_spill] sm:$0xff] (%p172_p4), %v1748_v9  ;;  %v516_v18 = vsub.f32 (%p172_p4), %v1728_v2, %v1748_v9  ;;  %v296_v9 = vunpack.c.0.s8 (%p172_p4), %v295_v53  ;;  %v1900_v53 = vand.u32 (%p172_p4), 4294901760, %v1868_v33 }
 0x2db   : >> { %v241_v7 = vpop.xlane.xlu1 %240   ;;  %v1819_v39 = vsub.f32 (%p172_p4), %v264_v8, %v1772_v19 }
 0x2dc   : > { %v1743_v7 = vand.u32 4294901760, %v266_v59  ;;  %v517_v0 = vand.u32 4294901760, %v516_v18  ;;  %v252_v18 = vld [vmem:[#allocation2 + $0xa] sm:$0x1]  ;;  %v299_v41 = vsub.s32 %v296_v9, %v1800_v31  ;;  %v552_v31 = vand.u32 4294901760, %v551_v23 }
 0x2dd   : > { %v1850_v8 = vand.u32 4294901760, %v1819_v39  ;;  %v340_v42 = vcombine.low %v252_v18, %v253_v22 }
 0x2de   : > { %v1788_v27 = vsub.f32 %v266_v59, %v1743_v7  ;;  %v1844_v59 = vand.u32 4294901760, %v1791_v28  ;;  %1300 = vmatprep.subr.mxu0 %v1743_v7  ;;  %1327 = vmatprep.subr.mxu1 %v517_v0  ;;  %v307_v20 = vrot.slane %v291_v45, %v299_v41  ;;  %v314_v26 = vrot.slane %v292_v11, %v299_v41 }
 0x2df   : > { %2140 = vst [vmem:[#allocation11_spill] sm:$0xff] %v1850_v8  ;;  %v558_v32 = vsub.f32 %v1819_v39, %v1850_v8  ;;  %1301 = vmatpush3.msra.mxu0 %v1743_v7  ;;  %1328 = vmatpush3.msra.mxu1 %v517_v0  ;;  %v339_v8 = vcombine.low %v250_v54, %v251_v13 }
 0x2e0   : > { %v1816_v38 = vand.u32 4294901760, %v1788_v27  ;;  %v1884_v5 = vsub.f32 %v1791_v28, %v1844_v59  ;;  %1302 = vmatprep.subr.mxu0 %v1750_v10  ;;  %1329 = vmatprep.subr.mxu1 %v524_v44  ;;  %v342_v28 = vcombine.low %v256_v21, %v257_v6  ;;  %v1905_v6 = vsub.f32 %v1797_v30, %v1856_v16 }
 0x2e1   : > { %1303 = vmatpush3.msra.mxu0 %v1750_v10  ;;  %1330 = vmatpush3.msra.mxu1 %v524_v44  ;;  %v349_v54 = vrot.slane %v339_v8, %v299_v41  ;;  %v363_v45 = vrot.slane %v341_v43, %v299_v41  ;;  %v559_v11 = vand.u32 4294901760, %v558_v32  ;;  %v572_v30 = vsub.f32 %v1868_v33, %v1900_v53 }
 0x2e2   : > { %2138 = vst [vmem:[#allocation9_spill] sm:$0xff] %v1816_v38  ;;  %v544_v15 = vsub.f32 %v1788_v27, %v1816_v38  ;;  %v290_v38 = vcombine.low %v1810_v36, %v1812_v37  ;;  %v538_v36 = vand.u32 4294901760, %v537_v58  ;;  %v293_v37 = vcombine.low %v1836_v47, %v1838_v48  ;;  %1304 = vmatprep.subr.mxu0 %v1772_v19 }
 0x2e3   : > { %v565_v47 = vsub.f32 %v1834_v46, %v1862_v24  ;;  %v1896_v48 = vsub.f32 %v1794_v29, %v1847_v1  ;;  %1331 = vmatprep.subr.mxu1 %v531_v14  ;;  %1305 = vmatpush3.msra.mxu0 %v1772_v19  ;;  %v1909_v58 = vand.u32 4294901760, %v1884_v5  ;;  %v1921_v32 = vsub.f32 %v1865_v52, %v1888_v40 }
 0x2e4   : > { %v545_v0 = vand.u32 4294901760, %v544_v15  ;;  %v300_v9 = vrot.slane %v290_v38, %v299_v41  ;;  %1332 = vmatpush3.msra.mxu1 %v531_v14  ;;  %v321_v44 = vrot.slane %v293_v37, %v299_v41  ;;  %1306 = vmatprep.subr.mxu0 %v1781_v25  ;;  %v356_v38 = vrot.slane %v340_v42, %v299_v41 }
 0x2e5   : > { %1333 = vmatprep.subr.mxu1 %v538_v36  ;;  %1307 = vmatpush3.msra.mxu0 %v1781_v25  ;;  %v370_v14 = vrot.slane %v342_v28, %v299_v41  ;;  %v1916_v18 = vand.u32 4294901760, %v1896_v48  ;;  %v566_v21 = vand.u32 4294901760, %v565_v47  ;;  %v1927_v42 = vand.u32 4294901760, %v1905_v6 }
 0x2e6   : > { %v322_v29 = vcombine.low %v300_v9, %v307_v20  ;;  %1334 = vmatpush3.msra.mxu1 %v538_v36  ;;  %v323_v13 = vcombine.low %v314_v26, %v321_v44  ;;  %1308 = vmatprep.subr.mxu0 %v1805_v34  ;;  %v371_v15 = vcombine.low %v349_v54, %v356_v38  ;;  %v573_v52 = vand.u32 4294901760, %v572_v30 }
 0x2e7   : > { %1335 = vmatprep.subr.mxu1 %v545_v0  ;;  %1309 = vmatpush3.msra.mxu0 %v1805_v34  ;;  %v372_v23 = vcombine.low %v363_v45, %v370_v14  ;;  %v579_v36 = vsub.f32 %v1884_v5, %v1909_v58  ;;  %v586_v28 = vsub.f32 %v1896_v48, %v1916_v18  ;;  %v1934_v47 = vand.u32 4294901760, %v1921_v32 }
 0x2e8   : > { %v330_v8 = vrot.slane %v322_v29, %v299_v41  ;;  %1336 = vmatpush3.msra.mxu1 %v545_v0  ;;  %v337_v22 = vrot.slane %v323_v13, %v299_v41  ;;  %1310 = vmatprep.subr.mxu0 %v1844_v59  ;;  %v379_v37 = vrot.slane %v371_v15, %v299_v41 }
 0x2e9   : > { %1337 = vmatprep.subr.mxu1 %v552_v31  ;;  %1311 = vmatpush3.msra.mxu0 %v1844_v59  ;;  %v386_v0 = vrot.slane %v372_v23, %v299_v41  ;;  %v580_v41 = vand.u32 4294901760, %v579_v36  ;;  %v593_v26 = vsub.f32 %v1905_v6, %v1927_v42  ;;  %v587_v54 = vand.u32 4294901760, %v586_v28 }
 0x2ea   : > { %1338 = vmatpush3.msra.mxu1 %v552_v31  ;;  %v338_v43 = vcombine.low %v330_v8, %v337_v22  ;;  %1312 = vmatprep.subr.mxu0 %v1847_v1  ;;  %v600_v29 = vsub.f32 %v1921_v32, %v1934_v47 }
 0x2eb   : > { %1339 = vmatprep.subr.mxu1 %v559_v11  ;;  %1313 = vmatpush3.msra.mxu0 %v1847_v1  ;;  %v387_v20 = vcombine.low %v379_v37, %v386_v0 }
 0x2ec   : > { %1340 = vmatpush3.msra.mxu1 %v559_v11  ;;  %v1937_v9 = vand.u32 4294901760, %v338_v43  ;;  %1314 = vmatprep.subr.mxu0 %v1856_v16  ;;  %v594_v11 = vand.u32 4294901760, %v593_v26  ;;  %v601_v30 = vand.u32 4294901760, %v600_v29 }
 0x2ed   : > { %1341 = vmatprep.subr.mxu1 %v566_v21  ;;  %1315 = vmatpush3.msra.mxu0 %v1856_v16  ;;  %v1946_v44 = vand.u32 4294901760, %v387_v20 }
 0x2ee   : > { %1342 = vmatpush3.msra.mxu1 %v566_v21  ;;  %v1944_v31 = vsub.f32 %v338_v43, %v1937_v9  ;;  %1316 = vmatprep.subr.mxu0 %v1888_v40 }
 0x2ef   : > { %1343 = vmatprep.subr.mxu1 %v573_v52  ;;  %1317 = vmatpush3.msra.mxu0 %v1888_v40  ;;  %v1954_v45 = vsub.f32 %v387_v20, %v1946_v44 }
 0x2f0   : > { %1344 = vmatpush3.msra.mxu1 %v573_v52  ;;  %v473_v38 = vand.u32 4294901760, %v1944_v31  ;;  %1356 = vmatprep.subr.mxu0 %v1715_v60 }
 0x2f1   : > { %1345 = vmatprep.subr.mxu1 %v580_v41  ;;  %v483_v14 = vand.u32 4294901760, %v1954_v45  ;;  %1353 = vmatprep.mubr.f32.mxu1 %v1937_v9 }
 0x2f2   : > { %v474_v13 = vsub.f32 %v1944_v31, %v473_v38  ;;  %1346 = vmatpush3.msra.mxu1 %v580_v41 }
 0x2f3   : > { %1347 = vmatprep.subr.mxu1 %v587_v54  ;;  %v484_v15 = vsub.f32 %v1954_v45, %v483_v14 }
 0x2f4   : > { %v475_v8 = vand.u32 4294901760, %v474_v13  ;;  %1348 = vmatpush3.msra.mxu1 %v587_v54 }
 0x2f5   : > { %1349 = vmatprep.subr.mxu1 %v594_v11  ;;  %v485_v22 = vand.u32 4294901760, %v484_v15 }
 0x2f6   : > { %1318 = vmatprep.mubr.f32.mxu0 %v475_v8  ;;  %1350 = vmatpush3.msra.mxu1 %v594_v11 }
 0x2f7   : > { %1351 = vmatprep.subr.mxu1 %v601_v30  ;;  %1319 = vmatmul.mubr.f32.vlgmr.msra.gmra.mxu0 %v485_v22 }
 0x2f8   : > { %1352 = vmatpush3.msra.mxu1 %v601_v30  ;;  %1357 = vmatpush3.msra.mxu0 %v1715_v60  ;;  %v2141_v60 = vld [vmem:[#allocation3_spill] sm:$0xff] }
 0x2f9   : > { %1354 = vmatmul.mubr.f32.vlgmr.msra.gmra.mxu1 %v1946_v44  ;;  %1358 = vmatprep.subr.mxu0 %v1718_v61 }
 0x2fa   : > { %1391 = vmatprep.subr.mxu1 %v1696_v49  ;;  %1359 = vmatpush3.msra.mxu0 %v1718_v61  ;;  %v2142_v61 = vld [vmem:[#allocation4_spill] sm:$0xff] }
 0x2fb   : > { %1392 = vmatpush3.msra.mxu1 %v1696_v49  ;;  %1360 = vmatprep.subr.mxu0 %v1723_v63 }
 0x2fc   : > { %1393 = vmatprep.subr.mxu1 %v1698_v50  ;;  %1361 = vmatpush3.msra.mxu0 %v1723_v63  ;;  %v2143_v63 = vld [vmem:[#allocation5_spill] sm:$0xff] }
 0x2fd   : > { %1394 = vmatpush3.msra.mxu1 %v1698_v50  ;;  %1362 = vmatprep.subr.mxu0 %v1728_v2 }
 0x2fe   : > { %1395 = vmatprep.subr.mxu1 %v1700_v51  ;;  %1363 = vmatpush3.msra.mxu0 %v1728_v2  ;;  %v2144_v2 = vld [vmem:[#allocation6_spill] sm:$0xff] }
 0x2ff   : > { %1396 = vmatpush3.msra.mxu1 %v1700_v51  ;;  %1364 = vmatprep.subr.mxu0 %v1731_v3 }
 0x300   : > { %1397 = vmatprep.subr.mxu1 %v1705_v55  ;;  %1365 = vmatpush3.msra.mxu0 %v1731_v3  ;;  %v2145_v3 = vld [vmem:[#allocation7_spill] sm:$0xff] }
 0x301   : > { %1398 = vmatpush3.msra.mxu1 %v1705_v55  ;;  %1366 = vmatprep.subr.mxu0 %v1756_v12 }
 0x302   : > { %1399 = vmatprep.subr.mxu1 %v1707_v56  ;;  %1367 = vmatpush3.msra.mxu0 %v1756_v12 }
 0x303   : > { %1400 = vmatpush3.msra.mxu1 %v1707_v56  ;;  %1368 = vmatprep.subr.mxu0 %v1767_v17 }
 0x304   : > { %1401 = vmatprep.subr.mxu1 %v1709_v57  ;;  %1369 = vmatpush3.msra.mxu0 %v1767_v17 }
 0x305   : > { %1402 = vmatpush3.msra.mxu1 %v1709_v57  ;;  %1370 = vmatprep.subr.mxu0 %v1788_v27 }
 0x306   : > { %1403 = vmatprep.subr.mxu1 %v1720_v62  ;;  %1371 = vmatpush3.msra.mxu0 %v1788_v27 }
 0x307   : > { %1404 = vmatpush3.msra.mxu1 %v1720_v62  ;;  %1372 = vmatprep.subr.mxu0 %v1808_v35 }
 0x308   : > { %1405 = vmatprep.subr.mxu1 %v1743_v7  ;;  %1373 = vmatpush3.msra.mxu0 %v1808_v35 }
 0x309   : > { %1406 = vmatpush3.msra.mxu1 %v1743_v7  ;;  %1374 = vmatprep.subr.mxu0 %v1819_v39 }
 0x30a   : > { %1407 = vmatprep.subr.mxu1 %v1750_v10  ;;  %1375 = vmatpush3.msra.mxu0 %v1819_v39 }
 0x30b   : > { %1408 = vmatpush3.msra.mxu1 %v1750_v10  ;;  %1376 = vmatprep.subr.mxu0 %v1834_v46 }
 0x30c   : > { %1409 = vmatprep.subr.mxu1 %v1772_v19  ;;  %1377 = vmatpush3.msra.mxu0 %v1834_v46 }
 0x30d   : > { %1410 = vmatpush3.msra.mxu1 %v1772_v19  ;;  %1378 = vmatprep.subr.mxu0 %v1868_v33 }
 0x30e   : > { %1411 = vmatprep.subr.mxu1 %v1781_v25  ;;  %1379 = vmatpush3.msra.mxu0 %v1868_v33 }
 0x30f   : > { %1412 = vmatpush3.msra.mxu1 %v1781_v25  ;;  %1380 = vmatprep.subr.mxu0 %v1884_v5 }
 0x310   : > { %1413 = vmatprep.subr.mxu1 %v1805_v34  ;;  %1381 = vmatpush3.msra.mxu0 %v1884_v5 }
 0x311   : > { %1388 = vmatprep.mubr.f32.mxu0 %v1944_v31  ;;  %1382 = vmatprep.subr.mxu0 %v1896_v48 }
 0x312   : > { %1414 = vmatpush3.msra.mxu1 %v1805_v34  ;;  %1383 = vmatpush3.msra.mxu0 %v1896_v48 }
 0x313   : > { %1415 = vmatprep.subr.mxu1 %v1844_v59  ;;  %1384 = vmatprep.subr.mxu0 %v1905_v6 }
 0x314   : > { %1416 = vmatpush3.msra.mxu1 %v1844_v59  ;;  %1385 = vmatpush3.msra.mxu0 %v1905_v6 }
 0x315   : > { %1417 = vmatprep.subr.mxu1 %v1847_v1  ;;  %1386 = vmatprep.subr.mxu0 %v1921_v32 }
 0x316   : > { %1418 = vmatpush3.msra.mxu1 %v1847_v1  ;;  %1387 = vmatpush3.msra.mxu0 %v1921_v32 }
 0x317   : > { %1419 = vmatprep.subr.mxu1 %v1856_v16  ;;  %1389 = vmatmul.mubr.f32.vlgmr.msra.gmra.mxu0 %v1954_v45 }
 0x318   : > { %1426 = vmatprep.subr.mxu0 %v1735_v4  ;;  %1420 = vmatpush3.msra.mxu1 %v1856_v16 }
 0x319   : > { %1427 = vmatpush3.msra.mxu0 %v1735_v4  ;;  %1421 = vmatprep.subr.mxu1 %v1888_v40  ;;  %v2146_v4 = vld [vmem:[#allocation8_spill] sm:$0xff] }
 0x31a   : > { %1428 = vmatprep.subr.mxu0 %v2141_v60  ;;  %1422 = vmatpush3.msra.mxu1 %v1888_v40 }
 0x31b   : > { %1429 = vmatpush3.msra.mxu0 %v2141_v60  ;;  %1423 = vmatprep.mubr.f32.mxu1 %v473_v38 }
 0x31c   : > { %1430 = vmatprep.subr.mxu0 %v2142_v61  ;;  %1424 = vmatmul.mubr.f32.vlgmr.msra.gmra.mxu1 %v483_v14 }
 0x31d   : > { %1431 = vmatpush3.msra.mxu0 %v2142_v61  ;;  %1461 = vmatprep.subr.mxu1 %v1696_v49 }
 0x31e   : > { %1432 = vmatprep.subr.mxu0 %v2143_v63  ;;  %1462 = vmatpush3.msra.mxu1 %v1696_v49  ;;  %v2147_v49 = vld [vmem:[#allocation9_spill] sm:$0xff] }
 0x31f   : > { %1433 = vmatpush3.msra.mxu0 %v2143_v63  ;;  %1463 = vmatprep.subr.mxu1 %v1698_v50 }
 0x320   : > { %1434 = vmatprep.subr.mxu0 %v2144_v2  ;;  %1464 = vmatpush3.msra.mxu1 %v1698_v50  ;;  %v2148_v50 = vld [vmem:[#allocation10_spill] sm:$0xff] }
 0x321   : > { %1435 = vmatpush3.msra.mxu0 %v2144_v2  ;;  %1465 = vmatprep.subr.mxu1 %v1700_v51 }
 0x322   : > { %1436 = vmatprep.subr.mxu0 %v2145_v3  ;;  %1466 = vmatpush3.msra.mxu1 %v1700_v51  ;;  %v2149_v51 = vld [vmem:[#allocation11_spill] sm:$0xff] }
 0x323   : > { %1437 = vmatpush3.msra.mxu0 %v2145_v3  ;;  %1467 = vmatprep.subr.mxu1 %v1705_v55 }
 0x324   : > { %1438 = vmatprep.subr.mxu0 %v2146_v4  ;;  %1468 = vmatpush3.msra.mxu1 %v1705_v55 }
 0x325   : > { %1439 = vmatpush3.msra.mxu0 %v2146_v4  ;;  %1469 = vmatprep.subr.mxu1 %v1707_v56 }
 0x326   : > { %1440 = vmatprep.subr.mxu0 %v2147_v49  ;;  %1470 = vmatpush3.msra.mxu1 %v1707_v56 }
 0x327   : > { %1441 = vmatpush3.msra.mxu0 %v2147_v49  ;;  %1471 = vmatprep.subr.mxu1 %v1709_v57 }
 0x328   : > { %1442 = vmatprep.subr.mxu0 %v2148_v50  ;;  %1472 = vmatpush3.msra.mxu1 %v1709_v57 }
 0x329   : > { %1443 = vmatpush3.msra.mxu0 %v2148_v50  ;;  %1473 = vmatprep.subr.mxu1 %v1720_v62 }
 0x32a   : > { %1444 = vmatprep.subr.mxu0 %v2149_v51  ;;  %1474 = vmatpush3.msra.mxu1 %v1720_v62 }
 0x32b   : > { %1445 = vmatpush3.msra.mxu0 %v2149_v51  ;;  %1475 = vmatprep.subr.mxu1 %v1743_v7 }
 0x32c   : > { %1446 = vmatprep.subr.mxu0 %v1862_v24  ;;  %1476 = vmatpush3.msra.mxu1 %v1743_v7 }
 0x32d   : > { %1447 = vmatpush3.msra.mxu0 %v1862_v24  ;;  %1477 = vmatprep.subr.mxu1 %v1750_v10 }
 0x32e   : > { %1448 = vmatprep.subr.mxu0 %v1900_v53  ;;  %1478 = vmatpush3.msra.mxu1 %v1750_v10 }
 0x32f   : > { %1449 = vmatpush3.msra.mxu0 %v1900_v53  ;;  %1479 = vmatprep.subr.mxu1 %v1772_v19 }
 0x330   : > { %1450 = vmatprep.subr.mxu0 %v1909_v58  ;;  %1480 = vmatpush3.msra.mxu1 %v1772_v19 }
 0x331   : > { %1451 = vmatpush3.msra.mxu0 %v1909_v58  ;;  %1481 = vmatprep.subr.mxu1 %v1781_v25 }
 0x332   : > { %1452 = vmatprep.subr.mxu0 %v1916_v18  ;;  %1482 = vmatpush3.msra.mxu1 %v1781_v25 }
 0x333   : > { %1453 = vmatpush3.msra.mxu0 %v1916_v18  ;;  %1483 = vmatprep.subr.mxu1 %v1805_v34 }
 0x334   : > { %1454 = vmatprep.subr.mxu0 %v1927_v42  ;;  %1458 = vmatprep.mubr.f32.mxu0 %v1937_v9 }
 0x335   : > { %1455 = vmatpush3.msra.mxu0 %v1927_v42  ;;  %1484 = vmatpush3.msra.mxu1 %v1805_v34 }
 0x336   : > { %1456 = vmatprep.subr.mxu0 %v1934_v47  ;;  %1485 = vmatprep.subr.mxu1 %v1844_v59 }
 0x337   : > { %1457 = vmatpush3.msra.mxu0 %v1934_v47  ;;  %1486 = vmatpush3.msra.mxu1 %v1844_v59 }
 0x338   : > { %1459 = vmatmul.mubr.f32.vlgmr.msra.gmra.mxu0 %v1946_v44  ;;  %1487 = vmatprep.subr.mxu1 %v1847_v1 }
 0x339   : > { %1493 = vmatprep.mubr.f32.mxu1 %v1937_v9  ;;  %1488 = vmatpush3.msra.mxu1 %v1847_v1 }
 0x33a   : > { %1489 = vmatprep.subr.mxu1 %v1856_v16 }
 0x33b   : > { %1490 = vmatpush3.msra.mxu1 %v1856_v16 }
 0x33c   : > { %1491 = vmatprep.subr.mxu1 %v1888_v40 }
 0x33d   : > { %1492 = vmatpush3.msra.mxu1 %v1888_v40 }
 0x33e   : > { %1494 = vmatmul.mubr.f32.vlgmr.msra.gmra.mxu1 %v1946_v44 }
 0x3b7   : > { %v1320_v55 = vpop.f32.mrf.mxu0 }
 0x3b9   : > { %v477_v56 = vpop.f32.mrf.mxu0  ;;  %v1355_v57 = vpop.f32.mrf.mxu1 }
 0x3ba   : > { %v645_v12 = vadd.f32 %v1355_v57, %v1320_v55 }
 0x3bb   : > { %v638_v5 = vpop.f32.mrf.mxu1 }
 0x3bc   : > { %v639_v19 = vadd.f32 %v638_v5, %v477_v56 }
 0x3d7   : > { %v1390_v62 = vpop.f32.mrf.mxu0 }
 0x3d8   : > { %v756_v25 = vadd.f32 %v1390_v62, %v645_v12 }
 0x3d9   : > { %v748_v7 = vpop.f32.mrf.mxu0 }
 0x3da   : > { %v749_v34 = vadd.f32 %v748_v7, %v639_v19 }
 0x3dc   : > { %v1425_v10 = vpop.f32.mrf.mxu1 }
 0x3dd   : > { %v853_v35 = vadd.f32 %v1425_v10, %v756_v25 }
 0x3de   : > { %v844_v27 = vpop.f32.mrf.mxu1 }
 0x3df   : > { %v845_v46 = vadd.f32 %v844_v27, %v749_v34 }
 0x3f8   : > { %v1460_v17 = vpop.f32.mrf.mxu0 }
 0x3f9   : > { %v978_v59 = vadd.f32 %v1460_v17, %v853_v35 }
 0x3fa   : > { %v971_v39 = vpop.f32.mrf.mxu0 }
 0x3fb   : > { %v972_v16 = vadd.f32 %v971_v39, %v845_v46 }
 0x3fe   : > { %v1495_v1 = vpop.f32.mrf.mxu1 }
 0x3ff   : > { %v1071_v24 = vadd.f32 %v1495_v1, %v978_v59 }
 0x400   : > { %v1064_v33 = vpop.f32.mrf.mxu1 }
 0x401   : > { %1076 = vst.msk [vmem:[%s1644_s22 + $0x8] sm:$0xff] %vm1074_vm5, %v1071_v24  ;;  %v1065_v40 = vadd.f32 %v1064_v33, %v972_v16 }
 0x403   : > { %1075 = vst.msk [vmem:[%s1644_s22] sm:$0xff] %vm1074_vm5, %v1065_v40 }
 0x404 PF: > { %s12_s9 = sadd.s32 1, %s1576_s9  }
 0x405   : > { %p9_p5 = scmp.ge.s32.totalorder %s12_s9, 4  }
 0x407   :  { %11 = sbr.rel (!%p9_p5) target bundleno = 1 (0x1), region = 80 }

</bundles_post_ra>
